<compile_context>
chip_gen: v6e
topology: v6e:2x2x1
jax: 0.10.0
libtpu: 0.0.40
codegen_flags: <defaults>
</compile_context>

<pallas_src>
import jax
import jax.numpy as jnp
from jax.experimental import pallas as pl
from jax.experimental.pallas import tpu as pltpu

LANE = 128  # vreg lane width


def critic_kernel(obs_ref, act_ref, w1o_ref, w1a_ref, b1_ref,
                  w2_ref, b2_ref, w3_ref, b3_ref, o_ref):
    # Activations are transposed: (hidden_padded, TB), batch on the lane axis.
    # Fused concat: [obs, act] @ W1 == W1[:od]^T @ obs^T + W1[od:]^T @ act^T.
    h1 = jnp.dot(w1o_ref[...], obs_ref[...], preferred_element_type=jnp.float32)
    h1 = h1 + jnp.dot(w1a_ref[...], act_ref[...], preferred_element_type=jnp.float32)
    h1 = jnp.maximum(h1 + b1_ref[...], 0.0)                               # (Hp, TB)

    h2 = jnp.dot(w2_ref[...], h1.astype(w2_ref.dtype),
                 preferred_element_type=jnp.float32)
    h2 = jnp.maximum(h2 + b2_ref[...], 0.0)                               # (Hp, TB)

    # Final layer (output width 1): VPU multiply + XLU sublane reduce.
    # Keeps the MXU free; b3 is a scalar read from SMEM.
    q = jnp.sum(h2 * w3_ref[...], axis=0, keepdims=True) + b3_ref[0, 0]   # (1, TB)

    # Lane-dense store: 4 bytes/row of output instead of the old 512 B/row.
    o_ref[...] = q


def init_params(key, in_dim, hidden):
    """nn.Linear-style init; weights stored (in_features, out_features)."""
    ks = jax.random.split(key, 6)

    def linear(kw, kb, fan_in, fan_out):
        bound = 1.0 / jnp.sqrt(jnp.float32(fan_in))
        w = jax.random.uniform(kw, (fan_in, fan_out), jnp.float32, -bound, bound)
        b = jax.random.uniform(kb, (1, fan_out), jnp.float32, -bound, bound)
        return w, b

    w1, b1 = linear(ks[0], ks[1], in_dim, hidden)
    w2, b2 = linear(ks[2], ks[3], hidden, hidden)
    w3, b3 = linear(ks[4], ks[5], hidden, 1)
    return (w1, b1, w2, b2, w3, b3)


def prepare_params(params, obs_dim, act_dim, mxu_dtype=jnp.float32):
    """One-time repack for the kernel: transpose for batch-on-lanes compute,
    split W1 for the fused concat, zero-pad the hidden dim up to a multiple of
    128 (math preserving).  mxu_dtype=jnp.bfloat16 is a cheap bandwidth win on
    v6e/v7x (f32 accumulation kept); default f32 matches the reference exactly."""
    w1, b1, w2, b2, w3, b3 = params
    H = w1.shape[1]
    Hp = max(LANE, ((H + LANE - 1) // LANE) * LANE)
    ph = Hp - H

    w1oT = jnp.pad(w1[:obs_dim].T, ((0, ph), (0, 0))).astype(mxu_dtype)            # (Hp, od)
    w1aT = jnp.pad(w1[obs_dim:obs_dim + act_dim].T,
                   ((0, ph), (0, 0))).astype(mxu_dtype)                             # (Hp, ad)
    b1c = jnp.pad(b1.reshape(-1, 1), ((0, ph), (0, 0)))                             # (Hp, 1)
    w2T = jnp.pad(w2.T, ((0, ph), (0, ph))).astype(mxu_dtype)                       # (Hp, Hp)
    b2c = jnp.pad(b2.reshape(-1, 1), ((0, ph), (0, 0)))                             # (Hp, 1)
    w3c = jnp.pad(w3.reshape(-1, 1), ((0, ph), (0, 0)))                             # (Hp, 1)
    return dict(w1oT=w1oT, w1aT=w1aT, b1=b1c, w2T=w2T, b2=b2c, w3=w3c,
                b3=b3.reshape(1, 1).astype(jnp.float32),
                hidden=H, mxu_dtype=mxu_dtype)


def _pick_tile_b(B):
    """Batch tile on the lane axis.  Big tiles amortize per-step pipeline
    overhead (v5e/v6e, one TensorCore); capped so batches >= 256 keep at least
    2 grid steps so ("parallel",) can shard across v7x's 2 TensorCores."""
    b128 = ((B + LANE - 1) // LANE) * LANE
    if b128 <= LANE:
        return LANE
    half = (b128 // 2) // LANE * LANE
    return max(LANE, min(1024, half))


def critic_forward(obs, act, kp):
    """obs: (B, obs_dim), act: (B, act_dim) -> (B, 1) float32 Q-values."""
    B, obs_dim = obs.shape
    act_dim = act.shape[1]
    Hp = kp["w2T"].shape[0]
    H = kp["hidden"]
    mxu_dtype = kp["mxu_dtype"]

    TB = _pick_tile_b(B)
    nb = pl.cdiv(B, TB)
    B_pad = nb * TB

    # Batch lives on the lane axis: lane-dense input tiles and a lane-dense
    # (1, TB) q output row per grid step.
    obsT = jnp.pad(obs.astype(mxu_dtype).T, ((0, 0), (0, B_pad - B)))   # (od, B_pad)
    actT = jnp.pad(act.astype(mxu_dtype).T, ((0, 0), (0, B_pad - B)))   # (ad, B_pad)

    full = lambda i: (0, 0)   # weights/biases: same block every step (VMEM-resident)
    tile = lambda i: (0, i)   # activations / output: walk the batch (lane) axis

    isz = jnp.dtype(mxu_dtype).itemsize
    cost = pl.CostEstimate(
        flops=2 * B_pad * ((obs_dim + act_dim) * H + H * H + H),
        transcendentals=0,
        bytes_accessed=(isz * (B_pad * (obs_dim + act_dim)               # inputs
                               + (obs_dim + act_dim) * Hp + Hp * Hp)     # MXU weights
                        + 4 * (B_pad + 3 * Hp + 1)),                     # q out + biases/w3
    )

    out = pl.pallas_call(
        critic_kernel,
        out_shape=jax.ShapeDtypeStruct((1, B_pad), jnp.float32),
        grid=(nb,),
        in_specs=[
            pl.BlockSpec((obs_dim, TB), tile),                  # obs^T tile (lane-dense)
            pl.BlockSpec((act_dim, TB), tile),                  # act^T tile (lane-dense)
            pl.BlockSpec((Hp, obs_dim), full),                  # W1[:obs_dim]^T
            pl.BlockSpec((Hp, act_dim), full),                  # W1[obs_dim:]^T
            pl.BlockSpec((Hp, 1), full),                        # b1 column
            pl.BlockSpec((Hp, Hp), full),                       # W2^T
            pl.BlockSpec((Hp, 1), full),                        # b2 column
            pl.BlockSpec((Hp, 1), full),                        # w3 column
            pl.BlockSpec(memory_space=pltpu.MemorySpace.SMEM),  # b3 scalar
        ],
        out_specs=pl.BlockSpec((1, TB), tile),
        compiler_params=pltpu.CompilerParams(
            dimension_semantics=("parallel",)),
        cost_estimate=cost,
    )(obsT, actT, kp["w1oT"], kp["w1aT"], kp["b1"], kp["w2T"], kp["b2"],
      kp["w3"], kp["b3"])

    # out is (1, B_pad); padded columns hold garbage (net(0)) and are sliced off.
    return out[0, :B].reshape(B, 1)


def critic_reference(obs, act, params):
    """Plain-JAX reference (unpadded, untransposed params) for correctness."""
    w1, b1, w2, b2, w3, b3 = params
    x = jnp.concatenate([obs, act], axis=1)
    x = jnp.maximum(x @ w1 + b1, 0.0)
    x = jnp.maximum(x @ w2 + b2, 0.0)
    return x @ w3 + b3


if __name__ == "__main__":
    # Small synthetic env: obs_dim=8, act_dim=4, layer_size(hidden)=32.
    obs_dim, act_dim, hidden = 8, 4, 32

    key = jax.random.PRNGKey(0)
    params = init_params(jax.random.fold_in(key, 7), obs_dim + act_dim, hidden)
    kparams = prepare_params(params, obs_dim, act_dim)   # f32 MXU operands (exact)

    # batch=2: tiny single-tile case; batch=300: ragged, multi-step grid.
    for batch in (2, 300):
        k_obs, k_act = jax.random.split(jax.random.fold_in(key, batch))
        obs = jax.random.normal(k_obs, (batch, obs_dim), jnp.float32)
        act = jax.random.normal(k_act, (batch, act_dim), jnp.float32)

        out = jax.block_until_ready(critic_forward(obs, act, kparams))
        ref = critic_reference(obs, act, params)

        assert out.shape == (batch, 1), out.shape
        assert jnp.allclose(out, ref, atol=1e-5, rtol=1e-5), (
            batch, float(jnp.max(jnp.abs(out - ref))))

    print("KERNEL_OK")
</pallas_src>

<mosaic_0001>
module attributes {stable_mosaic.version = 11 : i64} {
  func.func @critic_kernel(%arg0: i32, %arg1: memref<8x128xf32, #tpu.memory_space<vmem>>, %arg2: memref<4x128xf32, #tpu.memory_space<vmem>>, %arg3: memref<128x8xf32, #tpu.memory_space<vmem>>, %arg4: memref<128x4xf32, #tpu.memory_space<vmem>>, %arg5: memref<128x1xf32, #tpu.memory_space<vmem>>, %arg6: memref<128x128xf32, #tpu.memory_space<vmem>>, %arg7: memref<128x1xf32, #tpu.memory_space<vmem>>, %arg8: memref<128x1xf32, #tpu.memory_space<vmem>>, %arg9: memref<1x1xf32, #tpu.memory_space<smem>>, %arg10: memref<1x128xf32, #tpu.memory_space<vmem>>) attributes {dimension_semantics = [#tpu.dimension_semantics<parallel>], iteration_bounds = array<i64: 1>, scalar_prefetch = 0 : i64, scratch_operands = 0 : i64, tpu.core_type = #tpu.core_type<tc>, window_params = [{transform_indices = @transform_0, window_bounds = array<i64: 8, 128>}, {transform_indices = @transform_1, window_bounds = array<i64: 4, 128>}, {pipeline_mode = #tpu.pipeline_mode<synchronous>, transform_indices = @transform_2, window_bounds = array<i64: 128, 8>}, {pipeline_mode = #tpu.pipeline_mode<synchronous>, transform_indices = @transform_3, window_bounds = array<i64: 128, 4>}, {pipeline_mode = #tpu.pipeline_mode<synchronous>, transform_indices = @transform_4, window_bounds = array<i64: 128, 1>}, {pipeline_mode = #tpu.pipeline_mode<synchronous>, transform_indices = @transform_5, window_bounds = array<i64: 128, 128>}, {pipeline_mode = #tpu.pipeline_mode<synchronous>, transform_indices = @transform_6, window_bounds = array<i64: 128, 1>}, {pipeline_mode = #tpu.pipeline_mode<synchronous>, transform_indices = @transform_7, window_bounds = array<i64: 128, 1>}, {transform_indices = @transform_8, window_bounds = array<i64: 1, 1>}, {transform_indices = @transform_9, window_bounds = array<i64: 1, 128>}]} {
    %c0 = arith.constant 0 : index
    %c0_0 = arith.constant 0 : index
    %0 = vector.load %arg3[%c0, %c0_0] : memref<128x8xf32, #tpu.memory_space<vmem>>, vector<128x8xf32>
    %c0_1 = arith.constant 0 : index
    %c0_2 = arith.constant 0 : index
    %1 = vector.load %arg1[%c0_1, %c0_2] : memref<8x128xf32, #tpu.memory_space<vmem>>, vector<8x128xf32>
    %cst = arith.constant dense<0.000000e+00> : vector<128x128xf32>
    %2 = tpu.matmul %0, %1, %cst {dimension_numbers = #tpu.dot_dimension_numbers<[1], [0], [0], [1], [0, 0, 1, 1], [], []>} : vector<128x8xf32>, vector<8x128xf32>, vector<128x128xf32> -> vector<128x128xf32>
    %c0_3 = arith.constant 0 : index
    %c0_4 = arith.constant 0 : index
    %3 = vector.load %arg4[%c0_3, %c0_4] : memref<128x4xf32, #tpu.memory_space<vmem>>, vector<128x4xf32>
    %c0_5 = arith.constant 0 : index
    %c0_6 = arith.constant 0 : index
    %4 = vector.load %arg2[%c0_5, %c0_6] : memref<4x128xf32, #tpu.memory_space<vmem>>, vector<4x128xf32>
    %cst_7 = arith.constant dense<0.000000e+00> : vector<128x128xf32>
    %5 = tpu.matmul %3, %4, %cst_7 {dimension_numbers = #tpu.dot_dimension_numbers<[1], [0], [0], [1], [0, 0, 1, 1], [], []>} : vector<128x4xf32>, vector<4x128xf32>, vector<128x128xf32> -> vector<128x128xf32>
    %6 = arith.addf %2, %5 : vector<128x128xf32>
    %c0_8 = arith.constant 0 : index
    %c0_9 = arith.constant 0 : index
    %7 = vector.load %arg5[%c0_8, %c0_9] : memref<128x1xf32, #tpu.memory_space<vmem>>, vector<128x1xf32>
    %8 = vector.broadcast %7 : vector<128x1xf32> to vector<128x128xf32>
    %9 = arith.addf %6, %8 : vector<128x128xf32>
    %cst_10 = arith.constant 0.000000e+00 : f32
    %10 = vector.broadcast %cst_10 : f32 to vector<128x128xf32>
    %11 = arith.maximumf %9, %10 : vector<128x128xf32>
    %c0_11 = arith.constant 0 : index
    %c0_12 = arith.constant 0 : index
    %12 = vector.load %arg6[%c0_11, %c0_12] : memref<128x128xf32, #tpu.memory_space<vmem>>, vector<128x128xf32>
    %cst_13 = arith.constant dense<0.000000e+00> : vector<128x128xf32>
    %13 = tpu.matmul %12, %11, %cst_13 {dimension_numbers = #tpu.dot_dimension_numbers<[1], [0], [0], [1], [0, 0, 1, 1], [], []>} : vector<128x128xf32>, vector<128x128xf32>, vector<128x128xf32> -> vector<128x128xf32>
    %c0_14 = arith.constant 0 : index
    %c0_15 = arith.constant 0 : index
    %14 = vector.load %arg7[%c0_14, %c0_15] : memref<128x1xf32, #tpu.memory_space<vmem>>, vector<128x1xf32>
    %15 = vector.broadcast %14 : vector<128x1xf32> to vector<128x128xf32>
    %16 = arith.addf %13, %15 : vector<128x128xf32>
    %cst_16 = arith.constant 0.000000e+00 : f32
    %17 = vector.broadcast %cst_16 : f32 to vector<128x128xf32>
    %18 = arith.maximumf %16, %17 : vector<128x128xf32>
    %c0_17 = arith.constant 0 : index
    %c0_18 = arith.constant 0 : index
    %19 = vector.load %arg8[%c0_17, %c0_18] : memref<128x1xf32, #tpu.memory_space<vmem>>, vector<128x1xf32>
    %20 = vector.broadcast %19 : vector<128x1xf32> to vector<128x128xf32>
    %21 = arith.mulf %18, %20 : vector<128x128xf32>
    %cst_19 = arith.constant dense<0.000000e+00> : vector<128xf32>
    %22 = vector.multi_reduction <add>, %21, %cst_19 [0] : vector<128x128xf32> to vector<128xf32>
    %23 = vector.shape_cast %22 : vector<128xf32> to vector<1x128xf32>
    %c0_20 = arith.constant 0 : index
    %c0_21 = arith.constant 0 : index
    %24 = memref.load %arg9[%c0_20, %c0_21] : memref<1x1xf32, #tpu.memory_space<smem>>
    %25 = vector.broadcast %24 : f32 to vector<1x128xf32>
    %26 = arith.addf %23, %25 : vector<1x128xf32>
    %c0_22 = arith.constant 0 : index
    %c0_23 = arith.constant 0 : index
    %27 = vector.load %arg10[%c0_22, %c0_23] : memref<1x128xf32, #tpu.memory_space<vmem>>, vector<1x128xf32>
    tpu.vector_store %arg10[%c0_22, %c0_23], %26 {strides = array<i32>} : memref<1x128xf32, #tpu.memory_space<vmem>>, vector<1x128xf32>,
    return
  }
  func.func @transform_0(%arg0: i32) -> (i32, i32) {
    %c0_i32 = arith.constant 0 : i32
    %c0_i32_0 = arith.constant 0 : i32
    return %c0_i32, %arg0 : i32, i32
  }
  func.func @transform_1(%arg0: i32) -> (i32, i32) {
    %c0_i32 = arith.constant 0 : i32
    %c0_i32_0 = arith.constant 0 : i32
    return %c0_i32, %arg0 : i32, i32
  }
  func.func @transform_2(%arg0: i32) -> (i32, i32) {
    %c0_i32 = arith.constant 0 : i32
    %c0_i32_0 = arith.constant 0 : i32
    %c0_i32_1 = arith.constant 0 : i32
    return %c0_i32, %c0_i32_0 : i32, i32
  }
  func.func @transform_3(%arg0: i32) -> (i32, i32) {
    %c0_i32 = arith.constant 0 : i32
    %c0_i32_0 = arith.constant 0 : i32
    %c0_i32_1 = arith.constant 0 : i32
    return %c0_i32, %c0_i32_0 : i32, i32
  }
  func.func @transform_4(%arg0: i32) -> (i32, i32) {
    %c0_i32 = arith.constant 0 : i32
    %c0_i32_0 = arith.constant 0 : i32
    %c0_i32_1 = arith.constant 0 : i32
    return %c0_i32, %c0_i32_0 : i32, i32
  }
  func.func @transform_5(%arg0: i32) -> (i32, i32) {
    %c0_i32 = arith.constant 0 : i32
    %c0_i32_0 = arith.constant 0 : i32
    %c0_i32_1 = arith.constant 0 : i32
    return %c0_i32, %c0_i32_0 : i32, i32
  }
  func.func @transform_6(%arg0: i32) -> (i32, i32) {
    %c0_i32 = arith.constant 0 : i32
    %c0_i32_0 = arith.constant 0 : i32
    %c0_i32_1 = arith.constant 0 : i32
    return %c0_i32, %c0_i32_0 : i32, i32
  }
  func.func @transform_7(%arg0: i32) -> (i32, i32) {
    %c0_i32 = arith.constant 0 : i32
    %c0_i32_0 = arith.constant 0 : i32
    %c0_i32_1 = arith.constant 0 : i32
    return %c0_i32, %c0_i32_0 : i32, i32
  }
  func.func @transform_8(%arg0: i32) -> (i32, i32) {
    %c0_i32 = arith.constant 0 : i32
    %c0_i32_0 = arith.constant 0 : i32
    %c0_i32_1 = arith.constant 0 : i32
    return %c0_i32, %c0_i32_0 : i32, i32
  }
  func.func @transform_9(%arg0: i32) -> (i32, i32) {
    %c0_i32 = arith.constant 0 : i32
    %c0_i32_0 = arith.constant 0 : i32
    return %c0_i32, %arg0 : i32, i32
  }
}

</mosaic_0001>

<bundles_post_ra>
// kernel: tpu_custom_call.1
= control target key start
LH: loop header
LB: loop body
LE: loop exit
PB: predicated region body
PF: predicated region fallthrough
CT: control target
= control target key end

     0   :  { %vm117_vm0 = vcmask 1043456   ;;  %vm68_vm1 = vcmask 31744   ;;  %vm266_vm2 = vcmask 64512   ;;  %v1277_v12 = vmov 0   ;;  %s1703_s0 = inlined_call_operand.vmem [shape: f32[8,128], index: 0, kind: input, shape index: {}]   ;;  %s1704_s1 = inlined_call_operand.vmem [shape: f32[4,128], index: 1, kind: input, shape index: {}]   ;;  %s1705_s2 = inlined_call_operand.vmem [shape: f32[128,8], index: 2, kind: input, shape index: {}]   ;;  %s1706_s3 = inlined_call_operand.vmem [shape: f32[128,4], index: 3, kind: input, shape index: {}]   ;;  %s1707_s4 = inlined_call_operand.vmem [shape: f32[128,1], index: 4, kind: input, shape index: {}]   ;;  %s1708_s5 = inlined_call_operand.vmem [shape: f32[128,128], index: 5, kind: input, shape index: {}]   ;;  %s1709_s6 = inlined_call_operand.vmem [shape: f32[128,1], index: 6, kind: input, shape index: {}]   ;;  %s1710_s7 = inlined_call_operand.vmem [shape: f32[128,1], index: 7, kind: input, shape index: {}]   ;;  %s1711_s8 = inlined_call_operand.<no memory space> [shape: f32[1,1], index: 8, kind: input, shape index: {}]   ;;  %s1712_s9 = inlined_call_operand.hbm [shape: f32[1,128], index: 9, kind: output, shape index: {}]  }
   0x1   :  { %v67_v0 = vld [vmem:[%s1704_s1] sm:$0xf]  ;;  %v52_v4 = vld [vmem:[%s1706_s3 + $0x8] sm:$0xff]  ;;  %v53_v6 = vld [vmem:[%s1706_s3 + $0x10] sm:$0xff]  ;;  %1253 = vset.pattern.permute.xlu0 %v1277_v12  ;;  %1254 = vset.pattern.permute.xlu1 %v1277_v12 }
   0x2   :  { %v50_v1 = vld [vmem:[%s1703_s0] sm:$0xff]  ;;  %1111 = vmatprep.subr.msk.mxu0 %vm117_vm0, %v67_v0  ;;  %v35_v5 = vld [vmem:[%s1705_s2 + $0x8] sm:$0xff]  ;;  %v36_v7 = vld [vmem:[%s1705_s2 + $0x10] sm:$0xff] }
   0x3   :  { %v51_v2 = vld [vmem:[%s1706_s3] sm:$0xff]  ;;  %1137 = vmatprep.subr.mxu1 %v50_v1  ;;  %1112 = vmatpush3.msk.msra.mxu0 %vm117_vm0, %v67_v0  ;;  %v475_v8 = vld [vmem:[%s1707_s4 + $0x78] sm:$0xff]  ;;  %v473_v11 = vld [vmem:[%s1707_s4 + $0x68] sm:$0xff] }
   0x4   :  { %v34_v3 = vld [vmem:[%s1705_s2] sm:$0xff]  ;;  %1113 = vmatprep.mubr.msk.f32.mxu0 %vm68_vm1, %v51_v2  ;;  %1138 = vmatpush3.msra.mxu1 %v50_v1  ;;  %v54_v9 = vld [vmem:[%s1706_s3 + $0x18] sm:$0xff]  ;;  %v474_v15 = vld [vmem:[%s1707_s4 + $0x70] sm:$0xff] }
   0x5   :  { %1139 = vmatprep.mubr.msk.f32.mxu1 %vm266_vm2, %v34_v3  ;;  %1114 = vmatmul.mubr.msk.f32.vlgmr.msra.gmra.mxu0 %vm68_vm1, %v52_v4  ;;  %v37_v10 = vld [vmem:[%s1705_s2 + $0x18] sm:$0xff]  ;;  %v55_v13 = vld [vmem:[%s1706_s3 + $0x20] sm:$0xff]  ;;  %v56_v17 = vld [vmem:[%s1706_s3 + $0x28] sm:$0xff] }
   0x6   :  { %1140 = vmatmul.mubr.msk.f32.vlgmr.msra.gmra.mxu1 %vm266_vm2, %v35_v5  ;;  %1116 = vmatprep.mubr.msk.f32.mxu0 %vm68_vm1, %v53_v6  ;;  %v38_v14 = vld [vmem:[%s1705_s2 + $0x20] sm:$0xff]  ;;  %v39_v18 = vld [vmem:[%s1705_s2 + $0x28] sm:$0xff]  ;;  %v57_v19 = vld [vmem:[%s1706_s3 + $0x30] sm:$0xff] }
   0x7   :  { %1142 = vmatprep.mubr.msk.f32.mxu1 %vm266_vm2, %v36_v7  ;;  %553 = vperm.xlu0 %1253, %v475_v8   ;;  %v472_v16 = vld [vmem:[%s1707_s4 + $0x60] sm:$0xff]  ;;  %v40_v20 = vld [vmem:[%s1705_s2 + $0x30] sm:$0xff]  ;;  %v471_v21 = vld [vmem:[%s1707_s4 + $0x58] sm:$0xff] }
   0x8   :  { %543 = vperm.xlu1 %1254, %v473_v11   ;;  %v470_v22 = vld [vmem:[%s1707_s4 + $0x50] sm:$0xff]  ;;  %v58_v23 = vld [vmem:[%s1706_s3 + $0x38] sm:$0xff]  ;;  %v59_v25 = vld [vmem:[%s1706_s3 + $0x40] sm:$0xff] }
   0x9   :  { %1117 = vmatmul.mubr.msk.f32.gmra.mxu0 %vm68_vm1, %v54_v9  ;;  %v41_v24 = vld [vmem:[%s1705_s2 + $0x38] sm:$0xff]  ;;  %v42_v26 = vld [vmem:[%s1705_s2 + $0x40] sm:$0xff]  ;;  %v469_v27 = vld [vmem:[%s1707_s4 + $0x48] sm:$0xff] }
   0xa   :  { %1143 = vmatmul.mubr.msk.f32.gmra.mxu1 %vm266_vm2, %v37_v10  ;;  %1119 = vmatprep.mubr.msk.f32.mxu0 %vm68_vm1, %v55_v13  ;;  %v468_v28 = vld [vmem:[%s1707_s4 + $0x40] sm:$0xff]  ;;  %v60_v29 = vld [vmem:[%s1706_s3 + $0x48] sm:$0xff]  ;;  %v61_v31 = vld [vmem:[%s1706_s3 + $0x50] sm:$0xff] }
   0xb   :  { %1145 = vmatprep.mubr.msk.f32.mxu1 %vm266_vm2, %v38_v14  ;;  %548 = vperm.xlu0 %1253, %v474_v15   ;;  %v43_v30 = vld [vmem:[%s1705_s2 + $0x48] sm:$0xff]  ;;  %v44_v32 = vld [vmem:[%s1705_s2 + $0x50] sm:$0xff]  ;;  %v467_v33 = vld [vmem:[%s1707_s4 + $0x38] sm:$0xff] }
   0xc   :  { %538 = vperm.xlu1 %1254, %v472_v16   ;;  %v466_v34 = vld [vmem:[%s1707_s4 + $0x30] sm:$0xff]  ;;  %v62_v35 = vld [vmem:[%s1706_s3 + $0x58] sm:$0xff]  ;;  %v63_v37 = vld [vmem:[%s1706_s3 + $0x60] sm:$0xff] }
   0xd   :  { %1120 = vmatmul.mubr.msk.f32.gmra.mxu0 %vm68_vm1, %v56_v17  ;;  %v45_v36 = vld [vmem:[%s1705_s2 + $0x58] sm:$0xff]  ;;  %v46_v38 = vld [vmem:[%s1705_s2 + $0x60] sm:$0xff]  ;;  %v465_v39 = vld [vmem:[%s1707_s4 + $0x28] sm:$0xff] }
   0xe   :  { %1146 = vmatmul.mubr.msk.f32.gmra.mxu1 %vm266_vm2, %v39_v18  ;;  %1122 = vmatprep.mubr.msk.f32.mxu0 %vm68_vm1, %v57_v19  ;;  %v464_v40 = vld [vmem:[%s1707_s4 + $0x20] sm:$0xff]  ;;  %v64_v41 = vld [vmem:[%s1706_s3 + $0x68] sm:$0xff]  ;;  %v65_v43 = vld [vmem:[%s1706_s3 + $0x70] sm:$0xff] }
   0xf   :  { %1148 = vmatprep.mubr.msk.f32.mxu1 %vm266_vm2, %v40_v20  ;;  %533 = vperm.xlu0 %1253, %v471_v21   ;;  %v47_v42 = vld [vmem:[%s1705_s2 + $0x68] sm:$0xff]  ;;  %v48_v44 = vld [vmem:[%s1705_s2 + $0x70] sm:$0xff] }
  0x10   :  { %528 = vperm.xlu1 %1254, %v470_v22  }
  0x11   :  { %1123 = vmatmul.mubr.msk.f32.gmra.mxu0 %vm68_vm1, %v58_v23 }
  0x12   :  { %1149 = vmatmul.mubr.msk.f32.gmra.mxu1 %vm266_vm2, %v41_v24  ;;  %1125 = vmatprep.mubr.msk.f32.mxu0 %vm68_vm1, %v59_v25 }
  0x13   :  { %1151 = vmatprep.mubr.msk.f32.mxu1 %vm266_vm2, %v42_v26  ;;  %523 = vperm.xlu0 %1253, %v469_v27  }
  0x14   :  { %518 = vperm.xlu1 %1254, %v468_v28  }
  0x15   :  { %1126 = vmatmul.mubr.msk.f32.gmra.mxu0 %vm68_vm1, %v60_v29 }
  0x16   :  { %1152 = vmatmul.mubr.msk.f32.gmra.mxu1 %vm266_vm2, %v43_v30  ;;  %1128 = vmatprep.mubr.msk.f32.mxu0 %vm68_vm1, %v61_v31 }
  0x17   :  { %1154 = vmatprep.mubr.msk.f32.mxu1 %vm266_vm2, %v44_v32  ;;  %513 = vperm.xlu0 %1253, %v467_v33  }
  0x18   :  { %508 = vperm.xlu1 %1254, %v466_v34  }
  0x19   :  { %1129 = vmatmul.mubr.msk.f32.gmra.mxu0 %vm68_vm1, %v62_v35 }
  0x1a   :  { %1155 = vmatmul.mubr.msk.f32.gmra.mxu1 %vm266_vm2, %v45_v36  ;;  %1131 = vmatprep.mubr.msk.f32.mxu0 %vm68_vm1, %v63_v37 }
  0x1b   :  { %1157 = vmatprep.mubr.msk.f32.mxu1 %vm266_vm2, %v46_v38  ;;  %503 = vperm.xlu0 %1253, %v465_v39  }
  0x1c   :  { %498 = vperm.xlu1 %1254, %v464_v40  }
  0x1d   :  { %15 = vsyncpa [#allocation4], 0  ;;  %1132 = vmatmul.mubr.msk.f32.gmra.mxu0 %vm68_vm1, %v64_v41  ;;  %v463_v45 = vld [vmem:[%s1707_s4 + $0x18] sm:$0xff]  ;;  %v462_v46 = vld [vmem:[%s1707_s4 + $0x10] sm:$0xff]  ;;  %s1278_s27 = smov [#allocation3]  }
  0x1e   :  { %1158 = vmatmul.mubr.msk.f32.gmra.mxu1 %vm266_vm2, %v47_v42  ;;  %1134 = vmatprep.mubr.msk.f32.mxu0 %vm68_vm1, %v65_v43  ;;  %v66_v47 = vld [vmem:[%s1706_s3 + $0x78] sm:$0xff]  ;;  %v461_v49 = vld [vmem:[%s1707_s4 + $0x8] sm:$0xff]  ;;  %v460_v50 = vld [vmem:[%s1707_s4] sm:$0xff]  ;;  %s1004_s28 = sshll.u32 %s1278_s27, 4  ;;  %s1005_s28 = int_to_ptr.vmem [resolvable:$true] %s1004_s28 }
  0x1f   :  { %1160 = vmatprep.mubr.msk.f32.mxu1 %vm266_vm2, %v48_v44  ;;  %v49_v48 = vld [vmem:[%s1705_s2 + $0x78] sm:$0xff]  ;;  %493 = vperm.xlu0 %1253, %v463_v45   ;;  %v604_v51 = vld [vmem:[%s1709_s6] sm:$0xff]  ;;  %v605_v52 = vld [vmem:[%s1709_s6 + $0x8] sm:$0xff]  ;;  %s1255_s29 = scalar_lea.vmem %s1005_s28, 16  ;;  %s1259_s30 = scalar_lea.vmem %s1005_s28, 32 }
  0x20   :  { %488 = vperm.xlu1 %1254, %v462_v46   ;;  %v606_v53 = vld [vmem:[%s1709_s6 + $0x10] sm:$0xff]  ;;  %v607_v54 = vld [vmem:[%s1709_s6 + $0x18] sm:$0xff]  ;;  %v608_v55 = vld [vmem:[%s1709_s6 + $0x20] sm:$0xff]  ;;  %p1256_p0 = scmp.ne.s32.totalorder %s1005_s28, %s1255_s29  ;;  %p1260_p1 = scmp.lt.s32.totalorder %s1005_s28, %s1005_s28 }
  0x21   :  { %1135 = vmatmul.mubr.msk.f32.gmra.mxu0 %vm68_vm1, %v66_v47  ;;  %v861_v56 = vld [vmem:[%s1710_s7] sm:$0xff]  ;;  %v862_v57 = vld [vmem:[%s1710_s7 + $0x8] sm:$0xff]  ;;  %v863_v58 = vld [vmem:[%s1710_s7 + $0x10] sm:$0xff]  ;;  %p1261_p2 = scmp.lt.s32.totalorder %s1259_s30, %s1255_s29 }
  0x22   :  { %1161 = vmatmul.mubr.msk.f32.gmra.mxu1 %vm266_vm2, %v49_v48  ;;  %v609_v59 = vld [vmem:[%s1709_s6 + $0x28] sm:$0xff]  ;;  %v864_v60 = vld [vmem:[%s1710_s7 + $0x18] sm:$0xff]  ;;  %v610_v61 = vld [vmem:[%s1709_s6 + $0x30] sm:$0xff] }
  0x23   :  { %483 = vperm.xlu0 %1253, %v461_v49   ;;  %v865_v62 = vld [vmem:[%s1710_s7 + $0x20] sm:$0xff]  ;;  %v611_v63 = vld [vmem:[%s1709_s6 + $0x38] sm:$0xff]  ;;  %v866_v0 = vld [vmem:[%s1710_s7 + $0x28] sm:$0xff]  ;;  %p1262_p3 = por %p1261_p2, %p1260_p1 }
  0x24   :  { %478 = vperm.xlu1 %1254, %v460_v50   ;;  %v612_v1 = vld [vmem:[%s1709_s6 + $0x40] sm:$0xff]  ;;  %v867_v2 = vld [vmem:[%s1710_s7 + $0x30] sm:$0xff]  ;;  %v613_v3 = vld [vmem:[%s1709_s6 + $0x48] sm:$0xff] }
  0x25   :  { %v868_v4 = vld [vmem:[%s1710_s7 + $0x38] sm:$0xff]  ;;  %v614_v5 = vld [vmem:[%s1709_s6 + $0x50] sm:$0xff]  ;;  %v869_v6 = vld [vmem:[%s1710_s7 + $0x40] sm:$0xff]  ;;  %p1263_p4 = pnand %p1262_p3, %p1256_p0 }
  0x26   :  { %v615_v7 = vld [vmem:[%s1709_s6 + $0x58] sm:$0xff]  ;;  %v870_v8 = vld [vmem:[%s1710_s7 + $0x48] sm:$0xff]  ;;  %v616_v9 = vld [vmem:[%s1709_s6 + $0x60] sm:$0xff] }
  0x27   :  { %622 = vperm.xlu0 %1253, %v604_v51   ;;  %v871_v10 = vld [vmem:[%s1710_s7 + $0x50] sm:$0xff]  ;;  %v617_v11 = vld [vmem:[%s1709_s6 + $0x68] sm:$0xff]  ;;  %v872_v12 = vld [vmem:[%s1710_s7 + $0x58] sm:$0xff] }
  0x28   :  { %627 = vperm.xlu1 %1254, %v605_v52   ;;  %v618_v13 = vld [vmem:[%s1709_s6 + $0x70] sm:$0xff]  ;;  %v873_v14 = vld [vmem:[%s1710_s7 + $0x60] sm:$0xff]  ;;  %v619_v15 = vld [vmem:[%s1709_s6 + $0x78] sm:$0xff] }
  0x29   :  { %v874_v16 = vld [vmem:[%s1710_s7 + $0x68] sm:$0xff]  ;;  %v875_v17 = vld [vmem:[%s1710_s7 + $0x70] sm:$0xff]  ;;  %v876_v18 = vld [vmem:[%s1710_s7 + $0x78] sm:$0xff] }
  0x2a   :  { %v588_v19 = vld [vmem:[%s1708_s5] sm:$0xff] }
  0x2b   :  { %632 = vperm.xlu0 %1253, %v606_v53   ;;  %v596_v20 = vld [vmem:[%s1708_s5 + $0x40] sm:$0xff]  ;;  %1195 = vmatprep.mubr.f32.mxu0 %v588_v19 }
  0x2c   :  { %637 = vperm.xlu1 %1254, %v607_v54   ;;  %1207 = vmatprep.mubr.f32.mxu1 %v596_v20 }
  0x2f   :  { %642 = vperm.xlu0 %1253, %v608_v55  }
  0x30   :  { %879 = vperm.xlu1 %1254, %v861_v56  }
  0x33   :  { %884 = vperm.xlu0 %1253, %v862_v57  }
  0x34   :  { %889 = vperm.xlu1 %1254, %v863_v58  }
  0x37   :  { %647 = vperm.xlu0 %1253, %v609_v59  }
  0x38   :  { %894 = vperm.xlu1 %1254, %v864_v60  }
  0x3b   :  { %652 = vperm.xlu0 %1253, %v610_v61  }
  0x3c   :  { %899 = vperm.xlu1 %1254, %v865_v62  }
  0x3f   :  { %657 = vperm.xlu0 %1253, %v611_v63  }
  0x40   :  { %904 = vperm.xlu1 %1254, %v866_v0  }
  0x43   :  { %662 = vperm.xlu0 %1253, %v612_v1  }
  0x44   :  { %909 = vperm.xlu1 %1254, %v867_v2  }
  0x47   :  { %667 = vperm.xlu0 %1253, %v613_v3  }
  0x48   :  { %914 = vperm.xlu1 %1254, %v868_v4  }
  0x4b   :  { %672 = vperm.xlu0 %1253, %v614_v5  }
  0x4c   :  { %919 = vperm.xlu1 %1254, %v869_v6  }
  0x4f   :  { %677 = vperm.xlu0 %1253, %v615_v7  }
  0x50   :  { %924 = vperm.xlu1 %1254, %v870_v8  }
  0x53   :  { %682 = vperm.xlu0 %1253, %v616_v9  }
  0x54   :  { %929 = vperm.xlu1 %1254, %v871_v10  }
  0x57   :  { %687 = vperm.xlu0 %1253, %v617_v11  }
  0x58   :  { %934 = vperm.xlu1 %1254, %v872_v12  }
  0x5b   :  { %692 = vperm.xlu0 %1253, %v618_v13  }
  0x5c   :  { %939 = vperm.xlu1 %1254, %v873_v14  }
  0x5f   :  { %697 = vperm.xlu0 %1253, %v619_v15  }
  0x60   :  { %944 = vperm.xlu1 %1254, %v874_v16  }
  0x63   :  { %949 = vperm.xlu0 %1253, %v875_v17  }
  0x64   :  { %954 = vperm.xlu1 %1254, %v876_v18  }
  0x82   :  { %v554_v35 = vpop.permute.xlu0 %553 }
  0x83   :  { %v544_v38 = vpop.permute.xlu1 %543 }
  0x86   :  { %v549_v43 = vpop.permute.xlu0 %548 }
  0x87   :  { %v539_v46 = vpop.permute.xlu1 %538 }
  0x8a   :  { %v534_v51 = vpop.permute.xlu0 %533 }
  0x8b   :  { %v529_v54 = vpop.permute.xlu1 %528 }
  0x8e   :  { %v524_v0 = vpop.permute.xlu0 %523 }
  0x8f   :  { %v519_v5 = vpop.permute.xlu1 %518 }
  0x92   :  { %v514_v12 = vpop.permute.xlu0 %513 }
  0x93   :  { %v509_v16 = vpop.permute.xlu1 %508 }
  0xc5   :  { %v1613_v21 = vpop.f32.mrf.mxu0 }
  0xc6   :  { %v1615_v22 = vpop.f32.mrf.mxu1 }
  0xc7   :  { %v1617_v23 = vpop.f32.mrf.mxu0 }
  0xc8   :  { %v1619_v24 = vpop.f32.mrf.mxu1 }
  0xc9   :  { %v1621_v25 = vpop.f32.mrf.mxu0 }
  0xca   :  { %v1623_v26 = vpop.f32.mrf.mxu1 }
  0xcb   :  { %v1625_v27 = vpop.f32.mrf.mxu0 }
  0xcc   :  { %v1627_v28 = vpop.f32.mrf.mxu1 }
  0xcd   :  { %v1629_v29 = vpop.f32.mrf.mxu0 }
  0xce   :  { %v1631_v30 = vpop.f32.mrf.mxu1 }
  0xcf   :  { %v1633_v31 = vpop.f32.mrf.mxu0 }
  0xd0   :  { %v1635_v32 = vpop.f32.mrf.mxu1 }
  0xd1   :  { %v1124_v33 = vpop.f32.mrf.mxu0 }
  0xd2   :  { %v1150_v34 = vpop.f32.mrf.mxu1 }
  0xd3   :  { %v1637_v36 = vpop.f32.mrf.mxu0  ;;  %v417_v17 = vadd.f32 %v1150_v34, %v1124_v33 }
  0xd4   :  { %v1639_v37 = vpop.f32.mrf.mxu1 }
  0xd5   :  { %v1127_v39 = vpop.f32.mrf.mxu0  ;;  %v412_v20 = vadd.f32 %v1639_v37, %v1637_v36  ;;  %v563_v33 = vadd.f32 %v514_v12, %v417_v17  ;;  %v402_v36 = vadd.f32 %v1635_v32, %v1633_v31 }
  0xd6   :  { %v1153_v40 = vpop.f32.mrf.mxu1 }
  0xd7   :  { %v227_v41 = vpop.f32.mrf.mxu0  ;;  %v427_v9 = vadd.f32 %v1153_v40, %v1127_v39  ;;  %v504_v39 = vpop.permute.xlu0 %503  ;;  %v407_v40 = vadd.f32 %v1631_v30, %v1629_v29  ;;  %v562_v37 = vadd.f32 %v509_v16, %v412_v20  ;;  %v579_v30 = vmax.f32 %v563_v33, 0.0 }
  0xd8   :  { %v421_v42 = vpop.f32.mrf.mxu1 }
  0xd9   :  { %v1130_v44 = vpop.f32.mrf.mxu0  ;;  %v422_v13 = vadd.f32 %v421_v42, %v227_v41  ;;  %v565_v18 = vadd.f32 %v524_v0, %v427_v9  ;;  %v499_v41 = vpop.permute.xlu1 %498  ;;  %v561_v29 = vadd.f32 %v504_v39, %v407_v40  ;;  %v578_v32 = vmax.f32 %v562_v37, 0.0  ;;  %v602_v0 = vld [vmem:[%s1708_s5 + $0x70] sm:$0xff] }
  0xda   :  { %v1156_v45 = vpop.f32.mrf.mxu1  ;;  %v560_v31 = vadd.f32 %v499_v41, %v402_v36 }
  0xdb   :  { %v237_v47 = vpop.f32.mrf.mxu0  ;;  %v437_v1 = vadd.f32 %v1156_v45, %v1130_v44  ;;  %v581_v34 = vmax.f32 %v565_v18, 0.0  ;;  %v494_v44 = vpop.permute.xlu0 %493  ;;  %v392_v45 = vadd.f32 %v1627_v28, %v1625_v27 }
  0xdc   :  { %v431_v48 = vpop.f32.mrf.mxu1  ;;  %v576_v28 = vmax.f32 %v560_v31, 0.0 }
  0xdd   :  { %v1133_v49 = vpop.f32.mrf.mxu0  ;;  %v432_v6 = vadd.f32 %v431_v48, %v237_v47  ;;  %v567_v10 = vadd.f32 %v534_v51, %v437_v1  ;;  %v577_v47 = vmax.f32 %v561_v29, 0.0  ;;  %v382_v48 = vadd.f32 %v1619_v24, %v1617_v23  ;;  %v595_v1 = vld [vmem:[%s1708_s5 + $0x38] sm:$0xff] }
  0xde   :  { %v1159_v50 = vpop.f32.mrf.mxu1 }
  0xdf   :  { %v247_v52 = vpop.f32.mrf.mxu0  ;;  %v447_v57 = vadd.f32 %v1159_v50, %v1133_v49  ;;  %v566_v14 = vadd.f32 %v529_v54, %v432_v6  ;;  %v583_v19 = vmax.f32 %v567_v10, 0.0  ;;  %v484_v49 = vpop.permute.xlu0 %483  ;;  %v597_v54 = vld [vmem:[%s1708_s5 + $0x48] sm:$0xff] }
  0xe0   :  { %v441_v53 = vpop.f32.mrf.mxu1 }
  0xe1   :  { %v1136_v55 = vpop.f32.mrf.mxu0  ;;  %v442_v61 = vadd.f32 %v441_v53, %v247_v52  ;;  %v569_v2 = vadd.f32 %v544_v38, %v447_v57  ;;  %v582_v38 = vmax.f32 %v566_v14, 0.0  ;;  %v589_v53 = vld [vmem:[%s1708_s5 + $0x8] sm:$0xff]  ;;  %v591_v57 = vld [vmem:[%s1708_s5 + $0x18] sm:$0xff] }
  0xe2   :  { %v1162_v56 = vpop.f32.mrf.mxu1 }
  0xe3   :  { %v457_v58 = vadd.f32 %v1162_v56, %v1136_v55  ;;  %v257_v59 = vpop.f32.mrf.mxu0  ;;  %v568_v7 = vadd.f32 %v539_v46, %v442_v61  ;;  %v585_v11 = vmax.f32 %v569_v2, 0.0  ;;  %v489_v46 = vpop.permute.xlu1 %488  ;;  %v590_v55 = vld [vmem:[%s1708_s5 + $0x10] sm:$0xff]  ;;  %v593_v61 = vld [vmem:[%s1708_s5 + $0x28] sm:$0xff]  ;;  %v603_v2 = vld [vmem:[%s1708_s5 + $0x78] sm:$0xff] }
  0xe4   :  { %v451_v60 = vpop.f32.mrf.mxu1  ;;  %v558_v27 = vadd.f32 %v489_v46, %v392_v45  ;;  %v598_v56 = vld [vmem:[%s1708_s5 + $0x50] sm:$0xff] }
  0xe5   :  { %v571_v62 = vadd.f32 %v554_v35, %v457_v58  ;;  %v452_v63 = vadd.f32 %v451_v60, %v257_v59  ;;  %v584_v15 = vmax.f32 %v568_v7, 0.0  ;;  %v564_v35 = vadd.f32 %v519_v5, %v422_v13  ;;  %v599_v58 = vld [vmem:[%s1708_s5 + $0x58] sm:$0xff]  ;;  %v592_v59 = vld [vmem:[%s1708_s5 + $0x20] sm:$0xff] }
  0xe6   :  { %v574_v52 = vmax.f32 %v558_v27, 0.0  ;;  %v600_v60 = vld [vmem:[%s1708_s5 + $0x60] sm:$0xff] }
  0xe7   :  { %v587_v3 = vmax.f32 %v571_v62, 0.0  ;;  %v570_v4 = vadd.f32 %v549_v43, %v452_v63  ;;  %v580_v42 = vmax.f32 %v564_v35, 0.0  ;;  %v397_v43 = vadd.f32 %v1623_v26, %v1621_v25  ;;  %v601_v62 = vld [vmem:[%s1708_s5 + $0x68] sm:$0xff]  ;;  %v594_v63 = vld [vmem:[%s1708_s5 + $0x30] sm:$0xff] }
  0xe8   :  { %v387_v25 = vadd.f32 %v1615_v22, %v1613_v21  ;;  %v479_v21 = vpop.permute.xlu1 %478 }
  0xe9   :  { %v586_v8 = vmax.f32 %v570_v4, 0.0  ;;  %1163 = vmatprep.subr.mxu0 %v587_v3  ;;  %1219 = vmatprep.subr.mxu1 %v587_v3  ;;  %v559_v26 = vadd.f32 %v494_v44, %v397_v43  ;;  %v556_v22 = vadd.f32 %v479_v21, %v382_v48 }
  0xea   :  { %1164 = vmatpush3.msra.mxu0 %v587_v3  ;;  %1235 = vmatpush3.msra.mxu1 %v587_v3  ;;  %v557_v50 = vadd.f32 %v484_v49, %v387_v25  ;;  %v623_v3 = vpop.permute.xlu0 %622 }
  0xeb   :  { %1165 = vmatprep.subr.mxu0 %v586_v8  ;;  %1220 = vmatprep.subr.mxu1 %v586_v8  ;;  %v575_v51 = vmax.f32 %v559_v26, 0.0  ;;  %v572_v24 = vmax.f32 %v556_v22, 0.0 }
  0xec   :  { %1166 = vmatpush3.msra.mxu0 %v586_v8  ;;  %1236 = vmatpush3.msra.mxu1 %v586_v8  ;;  %v573_v23 = vmax.f32 %v557_v50, 0.0  ;;  %v628_v4 = vpop.permute.xlu1 %627 }
  0xed   :  { %1167 = vmatprep.subr.mxu0 %v585_v11  ;;  %1221 = vmatprep.subr.mxu1 %v585_v11 }
  0xee   :  { %1168 = vmatpush3.msra.mxu0 %v585_v11  ;;  %1237 = vmatpush3.msra.mxu1 %v585_v11  ;;  %v633_v5 = vpop.permute.xlu0 %632 }
  0xef   :  { %1169 = vmatprep.subr.mxu0 %v584_v15  ;;  %1222 = vmatprep.subr.mxu1 %v584_v15 }
  0xf0   :  { %1170 = vmatpush3.msra.mxu0 %v584_v15  ;;  %1238 = vmatpush3.msra.mxu1 %v584_v15  ;;  %v638_v6 = vpop.permute.xlu1 %637 }
  0xf1   :  { %1171 = vmatprep.subr.mxu0 %v583_v19  ;;  %1223 = vmatprep.subr.mxu1 %v583_v19 }
  0xf2   :  { %1172 = vmatpush3.msra.mxu0 %v583_v19  ;;  %1239 = vmatpush3.msra.mxu1 %v583_v19  ;;  %v643_v7 = vpop.permute.xlu0 %642 }
  0xf3   :  { %1173 = vmatprep.subr.mxu0 %v582_v38  ;;  %1224 = vmatprep.subr.mxu1 %v582_v38 }
  0xf4   :  { %1174 = vmatpush3.msra.mxu0 %v582_v38  ;;  %1240 = vmatpush3.msra.mxu1 %v582_v38  ;;  %v880_v8 = vpop.permute.xlu1 %879 }
  0xf5   :  { %1175 = vmatprep.subr.mxu0 %v581_v34  ;;  %1225 = vmatprep.subr.mxu1 %v581_v34 }
  0xf6   :  { %1176 = vmatpush3.msra.mxu0 %v581_v34  ;;  %1241 = vmatpush3.msra.mxu1 %v581_v34  ;;  %v885_v9 = vpop.permute.xlu0 %884 }
  0xf7   :  { %1177 = vmatprep.subr.mxu0 %v580_v42  ;;  %1226 = vmatprep.subr.mxu1 %v580_v42 }
  0xf8   :  { %1178 = vmatpush3.msra.mxu0 %v580_v42  ;;  %1242 = vmatpush3.msra.mxu1 %v580_v42  ;;  %v890_v10 = vpop.permute.xlu1 %889 }
  0xf9   :  { %1179 = vmatprep.subr.mxu0 %v579_v30  ;;  %1227 = vmatprep.subr.mxu1 %v579_v30 }
  0xfa   :  { %1180 = vmatpush3.msra.mxu0 %v579_v30  ;;  %1243 = vmatpush3.msra.mxu1 %v579_v30  ;;  %v648_v11 = vpop.permute.xlu0 %647 }
  0xfb   :  { %1181 = vmatprep.subr.mxu0 %v578_v32  ;;  %1228 = vmatprep.subr.mxu1 %v578_v32 }
  0xfc   :  { %1182 = vmatpush3.msra.mxu0 %v578_v32  ;;  %1244 = vmatpush3.msra.mxu1 %v578_v32  ;;  %v895_v12 = vpop.permute.xlu1 %894 }
  0xfd   :  { %1183 = vmatprep.subr.mxu0 %v577_v47  ;;  %1229 = vmatprep.subr.mxu1 %v577_v47 }
  0xfe   :  { %1184 = vmatpush3.msra.mxu0 %v577_v47  ;;  %1245 = vmatpush3.msra.mxu1 %v577_v47  ;;  %v653_v13 = vpop.permute.xlu0 %652 }
  0xff   :  { %1185 = vmatprep.subr.mxu0 %v576_v28  ;;  %1230 = vmatprep.subr.mxu1 %v576_v28 }
 0x100   :  { %1186 = vmatpush3.msra.mxu0 %v576_v28  ;;  %1246 = vmatpush3.msra.mxu1 %v576_v28  ;;  %v900_v14 = vpop.permute.xlu1 %899 }
 0x101   :  { %1187 = vmatprep.subr.mxu0 %v575_v51  ;;  %1231 = vmatprep.subr.mxu1 %v575_v51 }
 0x102   :  { %1188 = vmatpush3.msra.mxu0 %v575_v51  ;;  %1247 = vmatpush3.msra.mxu1 %v575_v51  ;;  %v658_v15 = vpop.permute.xlu0 %657 }
 0x103   :  { %1189 = vmatprep.subr.mxu0 %v574_v52  ;;  %1232 = vmatprep.subr.mxu1 %v574_v52 }
 0x104   :  { %1190 = vmatpush3.msra.mxu0 %v574_v52  ;;  %1248 = vmatpush3.msra.mxu1 %v574_v52  ;;  %v905_v16 = vpop.permute.xlu1 %904 }
 0x105   :  { %1191 = vmatprep.subr.mxu0 %v573_v23  ;;  %1233 = vmatprep.subr.mxu1 %v573_v23 }
 0x106   :  { %1192 = vmatpush3.msra.mxu0 %v573_v23  ;;  %1249 = vmatpush3.msra.mxu1 %v573_v23  ;;  %v663_v17 = vpop.permute.xlu0 %662 }
 0x107   :  { %1193 = vmatprep.subr.mxu0 %v572_v24  ;;  %1234 = vmatprep.subr.mxu1 %v572_v24 }
 0x108   :  { %1194 = vmatpush3.msra.mxu0 %v572_v24  ;;  %1250 = vmatpush3.msra.mxu1 %v572_v24  ;;  %v910_v18 = vpop.permute.xlu1 %909 }
 0x109   :  { %1196 = vmatmul.mubr.f32.vlgmr.msra.gmra.mxu0 %v589_v53  ;;  %1208 = vmatmul.mubr.f32.vlgmr.msra.gmra.mxu1 %v597_v54 }
 0x10a   :  { %1198 = vmatprep.mubr.f32.mxu0 %v590_v55  ;;  %1210 = vmatprep.mubr.f32.mxu1 %v598_v56  ;;  %v668_v19 = vpop.permute.xlu0 %667 }
 0x10c   :  { %v915_v20 = vpop.permute.xlu1 %914 }
 0x10d   :  { %1199 = vmatmul.mubr.f32.gmra.mxu0 %v591_v57  ;;  %1211 = vmatmul.mubr.f32.gmra.mxu1 %v599_v58 }
 0x10e   :  { %1201 = vmatprep.mubr.f32.mxu0 %v592_v59  ;;  %1213 = vmatprep.mubr.f32.mxu1 %v600_v60  ;;  %v673_v35 = vpop.permute.xlu0 %672 }
 0x110   :  { %v920_v38 = vpop.permute.xlu1 %919 }
 0x111   :  { %1202 = vmatmul.mubr.f32.gmra.mxu0 %v593_v61  ;;  %1214 = vmatmul.mubr.f32.gmra.mxu1 %v601_v62 }
 0x112   :  { %1204 = vmatprep.mubr.f32.mxu0 %v594_v63  ;;  %1216 = vmatprep.mubr.f32.mxu1 %v602_v0  ;;  %v678_v36 = vpop.permute.xlu0 %677 }
 0x114   :  { %v925_v29 = vpop.permute.xlu1 %924 }
 0x115   :  { %1205 = vmatmul.mubr.f32.gmra.mxu0 %v595_v1  ;;  %1217 = vmatmul.mubr.f32.gmra.mxu1 %v603_v2 }
 0x116   :  { %v683_v49 = vpop.permute.xlu0 %682 }
 0x118   :  { %v930_v51 = vpop.permute.xlu1 %929 }
 0x11a   :  { %v688_v63 = vpop.permute.xlu0 %687 }
 0x1c9   :  { %v1197_v39 = vpop.f32.mrf.mxu0  ;;  %v1209_v40 = vpop.f32.mrf.mxu1 }
 0x1ca   :  { %v772_v33 = vadd.f32 %v1197_v39, %v628_v4  ;;  %v812_v0 = vadd.f32 %v1209_v40, %v668_v19 }
 0x1cb   :  { %v766_v34 = vpop.f32.mrf.mxu0  ;;  %v806_v41 = vpop.f32.mrf.mxu1 }
 0x1cc   :  { %v767_v37 = vadd.f32 %v766_v34, %v623_v3  ;;  %v846_v30 = vmax.f32 %v772_v33, 0.0  ;;  %v807_v59 = vadd.f32 %v806_v41, %v663_v17 }
 0x1cd   :  { %v1200_v42 = vpop.f32.mrf.mxu0  ;;  %v1212_v43 = vpop.f32.mrf.mxu1 }
 0x1ce   :  { %v845_v44 = vmax.f32 %v767_v37, 0.0  ;;  %v782_v45 = vadd.f32 %v1200_v42, %v638_v6  ;;  %v958_v48 = vmul.f32 %v885_v9, %v846_v30  ;;  %v935_v6 = vpop.permute.xlu1 %934 }
 0x1cf   :  { %v776_v31 = vpop.f32.mrf.mxu0  ;;  %v816_v26 = vpop.f32.mrf.mxu1 }
 0x1d0   :  { %v957_v32 = vmul.f32 %v880_v8, %v845_v44  ;;  %v777_v46 = vadd.f32 %v776_v31, %v633_v5  ;;  %v848_v25 = vmax.f32 %v782_v45, 0.0  ;;  %v817_v8 = vadd.f32 %v816_v26, %v673_v35 }
 0x1d1   :  { %v1203_v47 = vpop.f32.mrf.mxu0  ;;  %v1215_v24 = vpop.f32.mrf.mxu1 }
 0x1d2   :  { %v847_v27 = vmax.f32 %v777_v46, 0.0  ;;  %v792_v28 = vadd.f32 %v1203_v47, %v648_v11  ;;  %v973_v21 = vadd.f32 %v958_v48, %v957_v32  ;;  %v960_v23 = vmul.f32 %v895_v12, %v848_v25  ;;  %v940_v40 = vpop.permute.xlu1 %939 }
 0x1d3   :  { %v786_v50 = vpop.f32.mrf.mxu0  ;;  %v826_v1 = vpop.f32.mrf.mxu1  ;;  %v854_v12 = vmax.f32 %v812_v0, 0.0  ;;  %v832_v42 = vadd.f32 %v1215_v24, %v688_v63 }
 0x1d4   :  { %v959_v22 = vmul.f32 %v890_v10, %v847_v27  ;;  %v787_v52 = vadd.f32 %v786_v50, %v643_v7  ;;  %v850_v55 = vmax.f32 %v792_v28, 0.0  ;;  %v853_v7 = vmax.f32 %v807_v59, 0.0 }
 0x1d5   :  { %v1206_v53 = vpop.f32.mrf.mxu0  ;;  %v1218_v11 = vpop.f32.mrf.mxu1  ;;  %v827_v34 = vadd.f32 %v826_v1, %v683_v49  ;;  %v966_v41 = vmul.f32 %v925_v29, %v854_v12 }
 0x1d6   :  { %v974_v54 = vadd.f32 %v973_v21, %v959_v22  ;;  %v849_v56 = vmax.f32 %v787_v52, 0.0  ;;  %v802_v57 = vadd.f32 %v1206_v53, %v658_v15  ;;  %v962_v2 = vmul.f32 %v905_v16, %v850_v55  ;;  %v945_v46 = vpop.permute.xlu1 %944 }
 0x1d7   :  { %v796_v58 = vpop.f32.mrf.mxu0  ;;  %v822_v15 = vadd.f32 %v1212_v43, %v678_v36  ;;  %v965_v33 = vmul.f32 %v920_v38, %v853_v7  ;;  %v836_v16 = vpop.f32.mrf.mxu1  ;;  %v857_v35 = vmax.f32 %v827_v34, 0.0  ;;  %v858_v36 = vmax.f32 %v832_v42, 0.0 }
 0x1d8   :  { %v961_v60 = vmul.f32 %v900_v14, %v849_v56  ;;  %v975_v61 = vadd.f32 %v974_v54, %v960_v23  ;;  %v797_v62 = vadd.f32 %v796_v58, %v653_v13  ;;  %v852_v4 = vmax.f32 %v802_v57, 0.0  ;;  %v693_v14 = vpop.permute.xlu0 %692 }
 0x1d9   :  { %v855_v13 = vmax.f32 %v817_v8, 0.0  ;;  %v856_v37 = vmax.f32 %v822_v15, 0.0  ;;  %v837_v45 = vadd.f32 %v836_v16, %v693_v14  ;;  %v969_v38 = vmul.f32 %v940_v40, %v857_v35 }
 0x1da   :  { %v976_v3 = vadd.f32 %v975_v61, %v961_v60  ;;  %v851_v5 = vmax.f32 %v797_v62, 0.0  ;;  %v964_v39 = vmul.f32 %v915_v20, %v852_v4  ;;  %v970_v47 = vmul.f32 %v945_v46, %v858_v36  ;;  %v955_v50 = vpop.permute.xlu1 %954 }
 0x1db   :  { %v967_v44 = vmul.f32 %v930_v51, %v855_v13  ;;  %v968_v32 = vmul.f32 %v935_v6, %v856_v37  ;;  %v859_v25 = vmax.f32 %v837_v45, 0.0  ;;  %v995_v55 = vstv %s1711_s8 }
 0x1dc   :  { %v963_v9 = vmul.f32 %v910_v18, %v851_v5  ;;  %v977_v10 = vadd.f32 %v976_v3, %v962_v2  ;;  %v698_v31 = vpop.permute.xlu0 %697 }
 0x1dd   :  { %v842_v20 = vadd.f32 %v1218_v11, %v698_v31 }
 0x1de   :  { %v978_v17 = vadd.f32 %v977_v10, %v963_v9 }
 0x1df   :  { %v860_v48 = vmax.f32 %v842_v20, 0.0 }
 0x1e0   :  { %v979_v19 = vadd.f32 %v978_v17, %v964_v39  ;;  %v950_v29 = vpop.permute.xlu0 %949 }
 0x1e1   :  { %v971_v28 = vmul.f32 %v950_v29, %v859_v25  ;;  %v972_v51 = vmul.f32 %v955_v50, %v860_v48 }
 0x1e2   :  { %v980_v30 = vadd.f32 %v979_v19, %v965_v33 }
 0x1e4   :  { %v981_v18 = vadd.f32 %v980_v30, %v966_v41 }
 0x1e6   :  { %v982_v43 = vadd.f32 %v981_v18, %v967_v44 }
 0x1e8   :  { %v983_v26 = vadd.f32 %v982_v43, %v968_v32 }
 0x1ea   :  { %v984_v27 = vadd.f32 %v983_v26, %v969_v38 }
 0x1ec   :  { %v985_v49 = vadd.f32 %v984_v27, %v970_v47 }
 0x1ee   :  { %v986_v21 = vadd.f32 %v985_v49, %v971_v28 }
 0x1f0   :  { %v987_v22 = vadd.f32 %v986_v21, %v972_v51 }
 0x1f2   :  { %v988_v52 = vrot.slane %v987_v22, 4 }
 0x1f4   :  { %v989_v23 = vadd.f32 %v988_v52, %v987_v22 }
 0x1f6   :  { %v990_v24 = vrot.slane %v989_v23, 2 }
 0x1f8   :  { %v991_v53 = vadd.f32 %v990_v24, %v989_v23 }
 0x1fa   :  { %v992_v54 = vrot.slane %v991_v53, 1 }
 0x1fc   :  { %v993_v56 = vadd.f32 %v992_v54, %v991_v53 }
 0x1fe   :  { %v996_v57 = vadd.f32 %v995_v55, %v993_v56 }
 0x200   :  { %997 = vst [vmem:[#allocation3] sm:$0x1] %v996_v57 }
 0x201   :  { %1266 = shalt.err (!%p1263_p4)
}
 0x202   :  { %1007 = dma.vmem_to_hbm [thread:$0]  %s1005_s28, 16, %s1712_s9, [#allocation4]  }
 0x203   :  { %1275 = dma.done.wait [#allocation4], 16  }
 0x204   :  { %1276 = vsyncadd [#allocation4], 4294967280 }
 0x205   :  { %1011 = vsyncpa [#allocation4], 1 }

</bundles_post_ra>
